<compile_context>
chip_gen: v7x
topology: tpu7x:2x2x1
jax: 0.10.0
libtpu: 0.0.40
codegen_flags: <defaults>
</compile_context>

<pallas_src>
import math
import functools

import jax
import jax.numpy as jnp
from jax import lax
from jax.experimental import pallas as pl
from jax.experimental.pallas import tpu as pltpu

# ---------------- config (small, consistent with the module) ----------------
B = 2         # batch
S = 8         # seq len
H = 32        # hidden_size
NH = 4        # num_attention_heads
HD = H // NH  # attention_head_size
I = 64        # intermediate_size
EPS = 1e-5


# ---------------------------- Pallas kernel ---------------------------------
def _layernorm(y, gamma, beta):
    u = jnp.mean(y, axis=-1, keepdims=True)
    c = y - u
    s = jnp.mean(c * c, axis=-1, keepdims=True)
    return gamma * (c * lax.rsqrt(s + EPS)) + beta


def bert_layer_kernel(x_ref, mask_ref,
                      wqkv_ref, bqkv_ref, wo_ref, bo_ref,
                      g1_ref, b1_ref, w1_ref, bi1_ref,
                      w2_ref, bi2_ref, g2_ref, b2_ref,
                      out_ref, *, num_heads):
    s, h = x_ref.shape            # (S, H) — one batch element per grid step
    x = x_ref[...]                # (S, H)
    mask = mask_ref[...]          # (S, S) additive mask for this batch element

    # Packed, head-batched QKV projection: one batched dot_general; q/k/v are
    # leading-axis (whole-vreg) slices — no width-HD lane extraction anywhere.
    xb = jnp.broadcast_to(x[None], (3 * num_heads, s, h))                  # (3NH, S, H)
    qkv = jnp.einsum('hse,hed->hsd', xb, wqkv_ref[...],
                     preferred_element_type=jnp.float32) + bqkv_ref[...]   # (3NH, S, HD)
    q = qkv[:num_heads]                    # (NH, S, HD), 1/sqrt(HD) already folded in
    k = qkv[num_heads:2 * num_heads]       # (NH, S, HD)
    v = qkv[2 * num_heads:]                # (NH, S, HD)

    # Head-batched attention; softmax batched over all heads at once.
    scores = jnp.einsum('hqd,hkd->hqk', q, k,
                        preferred_element_type=jnp.float32) + mask[None]   # (NH, S, S)
    m = jnp.max(scores, axis=-1, keepdims=True)
    p = jnp.exp(scores - m)
    d = jnp.sum(p, axis=-1, keepdims=True)
    r = pl.reciprocal(d, approx=True)
    r = r * (2.0 - d * r)                  # one Newton step -> full f32 accuracy
    p = p * r
    ctx = jnp.einsum('hqk,hkd->hqd', p, v,
                     preferred_element_type=jnp.float32)                   # (NH, S, HD)

    # Output dense: one batched dot against the per-head row blocks of wo,
    # reduced over heads with cheap vreg adds (no lane-side head concat).
    proj = jnp.einsum('hsd,hde->hse', ctx, wo_ref[...],
                      preferred_element_type=jnp.float32).sum(axis=0)      # (S, H)
    attn_out = _layernorm(proj + bo_ref[...] + x, g1_ref[...], b1_ref[...])

    inter = jnp.dot(attn_out, w1_ref[...],
                    preferred_element_type=jnp.float32) + bi1_ref[...]     # (S, I)
    # BERT gelu: x * 0.5 * (1 + erf(x / sqrt(2)))
    inter = inter * 0.5 * (1.0 + lax.erf(inter * (1.0 / math.sqrt(2.0))))
    ffn = jnp.dot(inter, w2_ref[...],
                  preferred_element_type=jnp.float32) + bi2_ref[...]       # (S, H)
    out_ref[...] = _layernorm(ffn + attn_out,
                              g2_ref[...], b2_ref[...]).astype(out_ref.dtype)


# ------------------------------ wrapper --------------------------------------
def prepare_params(p):
    """One-time parameter packing (hoisted out of the per-call path)."""
    scale = 1.0 / math.sqrt(HD)

    def head_cols_w(w):   # (H, H) -> (NH, H, HD): per-head column block
        return jnp.transpose(w.reshape(H, NH, HD), (1, 0, 2))

    def head_cols_b(b):   # (1, H) -> (NH, 1, HD)
        return b.reshape(NH, HD)[:, None, :]

    wqkv = jnp.concatenate([head_cols_w(p["wq"] * scale),
                            head_cols_w(p["wk"]),
                            head_cols_w(p["wv"])], axis=0)      # (3*NH, H, HD)
    bqkv = jnp.concatenate([head_cols_b(p["bq"] * scale),
                            head_cols_b(p["bk"]),
                            head_cols_b(p["bv"])], axis=0)      # (3*NH, 1, HD)
    return {
        "wqkv": wqkv, "bqkv": bqkv,
        "wo": p["wo"].reshape(NH, HD, H),                       # per-head row block
        "bo": p["bo"],
        "ln1_g": p["ln1_g"], "ln1_b": p["ln1_b"],
        "w1": p["w1"], "b1": p["b1"],
        "w2": p["w2"], "b2": p["b2"],
        "ln2_g": p["ln2_g"], "ln2_b": p["ln2_b"],
    }


@jax.jit
def bert_layer(hidden, mask, pp):
    """hidden: (B,S,H); mask: additive mask broadcastable to (B,1,S,S)
    (e.g. compact padding mask (B,1,1,S)); pp: prepare_params() output."""
    b, s, h = hidden.shape

    # Compact per-batch (S,S) mask; no (B*S,B*S) block-diagonal materialization.
    mask3d = jnp.broadcast_to(mask.astype(jnp.float32), (b, 1, s, s)).reshape(b, s, s)

    def const_spec(arr):   # whole array resident in VMEM; constant block index
        zeros = (0,) * arr.ndim
        return pl.BlockSpec(arr.shape, lambda i, _z=zeros: _z)

    weights = (pp["wqkv"], pp["bqkv"], pp["wo"], pp["bo"],
               pp["ln1_g"], pp["ln1_b"], pp["w1"], pp["b1"],
               pp["w2"], pp["b2"], pp["ln2_g"], pp["ln2_b"])

    kernel = functools.partial(bert_layer_kernel, num_heads=NH)
    return pl.pallas_call(
        kernel,
        grid=(b,),
        out_shape=jax.ShapeDtypeStruct((b, s, h), jnp.float32),
        in_specs=[pl.BlockSpec((None, s, h), lambda i: (i, 0, 0)),
                  pl.BlockSpec((None, s, s), lambda i: (i, 0, 0))]
                 + [const_spec(w) for w in weights],
        out_specs=pl.BlockSpec((None, s, h), lambda i: (i, 0, 0)),
        compiler_params=pltpu.CompilerParams(
            dimension_semantics=("parallel",)),
    )(hidden, mask3d, *weights)


# ---------------------- plain-JAX reference (for checking) -------------------
def bert_layer_ref(hidden, mask, p):
    def ln(y, g, b):
        u = y.mean(-1, keepdims=True)
        s = ((y - u) ** 2).mean(-1, keepdims=True)
        return g * ((y - u) / jnp.sqrt(s + EPS)) + b

    q = hidden @ p["wq"] + p["bq"]
    k = hidden @ p["wk"] + p["bk"]
    v = hidden @ p["wv"] + p["bv"]

    def split(x):
        return x.reshape(B, S, NH, HD).transpose(0, 2, 1, 3)   # (B, NH, S, HD)

    qh, kh, vh = split(q), split(k), split(v)
    scores = jnp.einsum("bhqd,bhkd->bhqk", qh / math.sqrt(HD), kh) + mask
    probs = jax.nn.softmax(scores, axis=-1)
    ctx = jnp.einsum("bhqk,bhkd->bhqd", probs, vh)
    ctx = ctx.transpose(0, 2, 1, 3).reshape(B, S, H)
    attn_out = ln(ctx @ p["wo"] + p["bo"] + hidden, p["ln1_g"], p["ln1_b"])

    inter = attn_out @ p["w1"] + p["b1"]
    inter = inter * 0.5 * (1.0 + lax.erf(inter / math.sqrt(2.0)))
    out = ln(inter @ p["w2"] + p["b2"] + attn_out, p["ln2_g"], p["ln2_b"])
    return out


# --------------------------------- main ---------------------------------------
def make_params(key):
    ks = jax.random.split(key, 8)
    scale = 0.02
    return {
        "wq": scale * jax.random.normal(ks[0], (H, H), jnp.float32),
        "bq": jnp.zeros((1, H), jnp.float32),
        "wk": scale * jax.random.normal(ks[1], (H, H), jnp.float32),
        "bk": jnp.zeros((1, H), jnp.float32),
        "wv": scale * jax.random.normal(ks[2], (H, H), jnp.float32),
        "bv": jnp.zeros((1, H), jnp.float32),
        "wo": scale * jax.random.normal(ks[3], (H, H), jnp.float32),
        "bo": 0.01 * jnp.ones((1, H), jnp.float32),
        "ln1_g": jnp.ones((1, H), jnp.float32),
        "ln1_b": jnp.zeros((1, H), jnp.float32),
        "w1": scale * jax.random.normal(ks[4], (H, I), jnp.float32),
        "b1": 0.01 * jnp.ones((1, I), jnp.float32),
        "w2": scale * jax.random.normal(ks[5], (I, H), jnp.float32),
        "b2": 0.01 * jnp.ones((1, H), jnp.float32),
        "ln2_g": jnp.ones((1, H), jnp.float32),
        "ln2_b": jnp.zeros((1, H), jnp.float32),
    }


if __name__ == "__main__":
    key = jax.random.PRNGKey(0)
    k_x, k_m, k_p = jax.random.split(key, 3)

    hidden = jax.random.normal(k_x, (B, S, H), jnp.float32)
    # compact additive attention mask: 0 = attend, -10000 = masked, (B,1,1,S)
    keep = (jax.random.uniform(k_m, (B, 1, 1, S)) > 0.2).astype(jnp.float32)
    mask = (1.0 - keep) * -10000.0

    params = make_params(k_p)
    prepped = prepare_params(params)   # one-time packing, off the per-call path

    out = jax.block_until_ready(bert_layer(hidden, mask, prepped))
    ref = bert_layer_ref(hidden, mask, params)

    assert out.shape == (B, S, H)
    max_err = float(jnp.max(jnp.abs(out - ref)))
    assert jnp.allclose(out, ref, atol=1e-4, rtol=1e-4), f"mismatch vs reference (max err {max_err})"

    print("KERNEL_OK")
</pallas_src>

<mosaic_0001>
module attributes {stable_mosaic.version = 11 : i64} {
  func.func @bert_layer_kernel(%arg0: i32, %arg1: memref<1x8x32xf32, #tpu.memory_space<vmem>>, %arg2: memref<1x8x8xf32, #tpu.memory_space<vmem>>, %arg3: memref<12x32x8xf32, #tpu.memory_space<vmem>>, %arg4: memref<12x1x8xf32, #tpu.memory_space<vmem>>, %arg5: memref<4x8x32xf32, #tpu.memory_space<vmem>>, %arg6: memref<1x32xf32, #tpu.memory_space<vmem>>, %arg7: memref<1x32xf32, #tpu.memory_space<vmem>>, %arg8: memref<1x32xf32, #tpu.memory_space<vmem>>, %arg9: memref<32x64xf32, #tpu.memory_space<vmem>>, %arg10: memref<1x64xf32, #tpu.memory_space<vmem>>, %arg11: memref<64x32xf32, #tpu.memory_space<vmem>>, %arg12: memref<1x32xf32, #tpu.memory_space<vmem>>, %arg13: memref<1x32xf32, #tpu.memory_space<vmem>>, %arg14: memref<1x32xf32, #tpu.memory_space<vmem>>, %arg15: memref<1x8x32xf32, #tpu.memory_space<vmem>>) attributes {dimension_semantics = [#tpu.dimension_semantics<parallel>], iteration_bounds = array<i64: 2>, scalar_prefetch = 0 : i64, scratch_operands = 0 : i64, tpu.core_type = #tpu.core_type<tc>, window_params = [{transform_indices = @transform_0, window_bounds = array<i64: 1, 8, 32>}, {transform_indices = @transform_1, window_bounds = array<i64: 1, 8, 8>}, {pipeline_mode = #tpu.pipeline_mode<synchronous>, transform_indices = @transform_2, window_bounds = array<i64: 12, 32, 8>}, {pipeline_mode = #tpu.pipeline_mode<synchronous>, transform_indices = @transform_3, window_bounds = array<i64: 12, 1, 8>}, {pipeline_mode = #tpu.pipeline_mode<synchronous>, transform_indices = @transform_4, window_bounds = array<i64: 4, 8, 32>}, {pipeline_mode = #tpu.pipeline_mode<synchronous>, transform_indices = @transform_5, window_bounds = array<i64: 1, 32>}, {pipeline_mode = #tpu.pipeline_mode<synchronous>, transform_indices = @transform_6, window_bounds = array<i64: 1, 32>}, {pipeline_mode = #tpu.pipeline_mode<synchronous>, transform_indices = @transform_7, window_bounds = array<i64: 1, 32>}, {pipeline_mode = #tpu.pipeline_mode<synchronous>, transform_indices = @transform_8, window_bounds = array<i64: 32, 64>}, {pipeline_mode = #tpu.pipeline_mode<synchronous>, transform_indices = @transform_9, window_bounds = array<i64: 1, 64>}, {pipeline_mode = #tpu.pipeline_mode<synchronous>, transform_indices = @transform_10, window_bounds = array<i64: 64, 32>}, {pipeline_mode = #tpu.pipeline_mode<synchronous>, transform_indices = @transform_11, window_bounds = array<i64: 1, 32>}, {pipeline_mode = #tpu.pipeline_mode<synchronous>, transform_indices = @transform_12, window_bounds = array<i64: 1, 32>}, {pipeline_mode = #tpu.pipeline_mode<synchronous>, transform_indices = @transform_13, window_bounds = array<i64: 1, 32>}, {transform_indices = @transform_14, window_bounds = array<i64: 1, 8, 32>}]} {
    %c0 = arith.constant 0 : index
    %c0_0 = arith.constant 0 : index
    %c0_1 = arith.constant 0 : index
    %0 = vector.load %arg1[%c0, %c0_0, %c0_1] : memref<1x8x32xf32, #tpu.memory_space<vmem>>, vector<1x8x32xf32>
    %1 = vector.shape_cast %0 : vector<1x8x32xf32> to vector<8x32xf32>
    %c0_2 = arith.constant 0 : index
    %c0_3 = arith.constant 0 : index
    %c0_4 = arith.constant 0 : index
    %2 = vector.load %arg2[%c0_2, %c0_3, %c0_4] : memref<1x8x8xf32, #tpu.memory_space<vmem>>, vector<1x8x8xf32>
    %3 = vector.shape_cast %2 : vector<1x8x8xf32> to vector<8x8xf32>
    %4 = vector.shape_cast %1 : vector<8x32xf32> to vector<1x8x32xf32>
    %5 = vector.shape_cast %4 : vector<1x8x32xf32> to vector<1x8x32xf32>
    %6 = vector.broadcast %5 : vector<1x8x32xf32> to vector<12x8x32xf32>
    %c0_5 = arith.constant 0 : index
    %c0_6 = arith.constant 0 : index
    %c0_7 = arith.constant 0 : index
    %7 = vector.load %arg3[%c0_5, %c0_6, %c0_7] : memref<12x32x8xf32, #tpu.memory_space<vmem>>, vector<12x32x8xf32>
    "tpu.trace_start"() <{level = 10 : i32, message = "hse,hed->hsd"}> : () -> ()
    %cst = arith.constant dense<0.000000e+00> : vector<12x8x8xf32>
    %8 = tpu.matmul %6, %7, %cst {dimension_numbers = #tpu.dot_dimension_numbers<[2], [1], [1], [2], [0, 0, 0, 1, 1, 2], [0], [0]>} : vector<12x8x32xf32>, vector<12x32x8xf32>, vector<12x8x8xf32> -> vector<12x8x8xf32>
    "tpu.trace_stop"() : () -> ()
    %c0_8 = arith.constant 0 : index
    %c0_9 = arith.constant 0 : index
    %c0_10 = arith.constant 0 : index
    %9 = vector.load %arg4[%c0_8, %c0_9, %c0_10] : memref<12x1x8xf32, #tpu.memory_space<vmem>>, vector<12x1x8xf32>
    %10 = vector.broadcast %9 : vector<12x1x8xf32> to vector<12x8x8xf32>
    %11 = arith.addf %8, %10 : vector<12x8x8xf32>
    %12 = vector.extract_strided_slice %11 {offsets = [0, 0, 0], sizes = [4, 8, 8], strides = [1, 1, 1]} : vector<12x8x8xf32> to vector<4x8x8xf32>
    %13 = vector.extract_strided_slice %11 {offsets = [4, 0, 0], sizes = [4, 8, 8], strides = [1, 1, 1]} : vector<12x8x8xf32> to vector<4x8x8xf32>
    %14 = vector.extract_strided_slice %11 {offsets = [8, 0, 0], sizes = [4, 8, 8], strides = [1, 1, 1]} : vector<12x8x8xf32> to vector<4x8x8xf32>
    "tpu.trace_start"() <{level = 10 : i32, message = "hqd,hkd->hqk"}> : () -> ()
    %cst_11 = arith.constant dense<0.000000e+00> : vector<4x8x8xf32>
    %15 = tpu.matmul %12, %13, %cst_11 {dimension_numbers = #tpu.dot_dimension_numbers<[2], [2], [1], [1], [0, 0, 0, 1, 1, 1], [0], [0]>} : vector<4x8x8xf32>, vector<4x8x8xf32>, vector<4x8x8xf32> -> vector<4x8x8xf32>
    "tpu.trace_stop"() : () -> ()
    %16 = vector.shape_cast %3 : vector<8x8xf32> to vector<1x8x8xf32>
    %17 = vector.broadcast %16 : vector<1x8x8xf32> to vector<4x8x8xf32>
    %18 = arith.addf %15, %17 : vector<4x8x8xf32>
    %cst_12 = arith.constant dense<0xFF800000> : vector<4x8xf32>
    %19 = vector.multi_reduction <maximumf>, %18, %cst_12 [2] : vector<4x8x8xf32> to vector<4x8xf32>
    %20 = vector.shape_cast %19 : vector<4x8xf32> to vector<4x8x1xf32>
    %21 = vector.broadcast %20 : vector<4x8x1xf32> to vector<4x8x8xf32>
    %22 = arith.subf %18, %21 : vector<4x8x8xf32>
    %23 = math.exp %22 : vector<4x8x8xf32>
    %cst_13 = arith.constant dense<0.000000e+00> : vector<4x8xf32>
    %24 = vector.multi_reduction <add>, %23, %cst_13 [2] : vector<4x8x8xf32> to vector<4x8xf32>
    %25 = vector.shape_cast %24 : vector<4x8xf32> to vector<4x8x1xf32>
    %26 = tpu.reciprocal %25 {approx = true} : vector<4x8x1xf32> -> vector<4x8x1xf32>
    %27 = arith.mulf %25, %26 : vector<4x8x1xf32>
    %cst_14 = arith.constant 2.000000e+00 : f32
    %28 = vector.broadcast %cst_14 : f32 to vector<4x8x1xf32>
    %29 = arith.subf %28, %27 : vector<4x8x1xf32>
    %30 = arith.mulf %26, %29 : vector<4x8x1xf32>
    %31 = vector.broadcast %30 : vector<4x8x1xf32> to vector<4x8x8xf32>
    %32 = arith.mulf %23, %31 : vector<4x8x8xf32>
    "tpu.trace_start"() <{level = 10 : i32, message = "hqk,hkd->hqd"}> : () -> ()
    %cst_15 = arith.constant dense<0.000000e+00> : vector<4x8x8xf32>
    %33 = tpu.matmul %32, %14, %cst_15 {dimension_numbers = #tpu.dot_dimension_numbers<[2], [1], [1], [2], [0, 0, 0, 1, 1, 2], [0], [0]>} : vector<4x8x8xf32>, vector<4x8x8xf32>, vector<4x8x8xf32> -> vector<4x8x8xf32>
    "tpu.trace_stop"() : () -> ()
    %c0_16 = arith.constant 0 : index
    %c0_17 = arith.constant 0 : index
    %c0_18 = arith.constant 0 : index
    %34 = vector.load %arg5[%c0_16, %c0_17, %c0_18] : memref<4x8x32xf32, #tpu.memory_space<vmem>>, vector<4x8x32xf32>
    "tpu.trace_start"() <{level = 10 : i32, message = "hsd,hde->hse"}> : () -> ()
    %cst_19 = arith.constant dense<0.000000e+00> : vector<4x8x32xf32>
    %35 = tpu.matmul %33, %34, %cst_19 {dimension_numbers = #tpu.dot_dimension_numbers<[2], [1], [1], [2], [0, 0, 0, 1, 1, 2], [0], [0]>} : vector<4x8x8xf32>, vector<4x8x32xf32>, vector<4x8x32xf32> -> vector<4x8x32xf32>
    "tpu.trace_stop"() : () -> ()
    %cst_20 = arith.constant dense<0.000000e+00> : vector<8x32xf32>
    %36 = vector.multi_reduction <add>, %35, %cst_20 [0] : vector<4x8x32xf32> to vector<8x32xf32>
    %c0_21 = arith.constant 0 : index
    %c0_22 = arith.constant 0 : index
    %37 = vector.load %arg6[%c0_21, %c0_22] : memref<1x32xf32, #tpu.memory_space<vmem>>, vector<1x32xf32>
    %38 = vector.broadcast %37 : vector<1x32xf32> to vector<8x32xf32>
    %39 = arith.addf %36, %38 : vector<8x32xf32>
    %40 = arith.addf %39, %1 : vector<8x32xf32>
    %c0_23 = arith.constant 0 : index
    %c0_24 = arith.constant 0 : index
    %41 = vector.load %arg7[%c0_23, %c0_24] : memref<1x32xf32, #tpu.memory_space<vmem>>, vector<1x32xf32>
    %c0_25 = arith.constant 0 : index
    %c0_26 = arith.constant 0 : index
    %42 = vector.load %arg8[%c0_25, %c0_26] : memref<1x32xf32, #tpu.memory_space<vmem>>, vector<1x32xf32>
    %cst_27 = arith.constant dense<0.000000e+00> : vector<8xf32>
    %43 = vector.multi_reduction <add>, %40, %cst_27 [1] : vector<8x32xf32> to vector<8xf32>
    %44 = vector.shape_cast %43 : vector<8xf32> to vector<8x1xf32>
    %cst_28 = arith.constant 3.200000e+01 : f32
    %45 = vector.broadcast %cst_28 : f32 to vector<8x1xf32>
    %46 = arith.divf %44, %45 : vector<8x1xf32>
    %47 = vector.broadcast %46 : vector<8x1xf32> to vector<8x32xf32>
    %48 = arith.subf %40, %47 : vector<8x32xf32>
    %49 = arith.mulf %48, %48 : vector<8x32xf32>
    %cst_29 = arith.constant dense<0.000000e+00> : vector<8xf32>
    %50 = vector.multi_reduction <add>, %49, %cst_29 [1] : vector<8x32xf32> to vector<8xf32>
    %51 = vector.shape_cast %50 : vector<8xf32> to vector<8x1xf32>
    %cst_30 = arith.constant 3.200000e+01 : f32
    %52 = vector.broadcast %cst_30 : f32 to vector<8x1xf32>
    %53 = arith.divf %51, %52 : vector<8x1xf32>
    %cst_31 = arith.constant 9.99999974E-6 : f32
    %54 = vector.broadcast %cst_31 : f32 to vector<8x1xf32>
    %55 = arith.addf %53, %54 : vector<8x1xf32>
    %56 = math.rsqrt %55 : vector<8x1xf32>
    %57 = vector.broadcast %56 : vector<8x1xf32> to vector<8x32xf32>
    %58 = arith.mulf %48, %57 : vector<8x32xf32>
    %59 = vector.broadcast %41 : vector<1x32xf32> to vector<8x32xf32>
    %60 = arith.mulf %59, %58 : vector<8x32xf32>
    %61 = vector.broadcast %42 : vector<1x32xf32> to vector<8x32xf32>
    %62 = arith.addf %60, %61 : vector<8x32xf32>
    %c0_32 = arith.constant 0 : index
    %c0_33 = arith.constant 0 : index
    %63 = vector.load %arg9[%c0_32, %c0_33] : memref<32x64xf32, #tpu.memory_space<vmem>>, vector<32x64xf32>
    %cst_34 = arith.constant dense<0.000000e+00> : vector<8x64xf32>
    %64 = tpu.matmul %62, %63, %cst_34 {dimension_numbers = #tpu.dot_dimension_numbers<[1], [0], [0], [1], [0, 0, 1, 1], [], []>} : vector<8x32xf32>, vector<32x64xf32>, vector<8x64xf32> -> vector<8x64xf32>
    %c0_35 = arith.constant 0 : index
    %c0_36 = arith.constant 0 : index
    %65 = vector.load %arg10[%c0_35, %c0_36] : memref<1x64xf32, #tpu.memory_space<vmem>>, vector<1x64xf32>
    %66 = vector.broadcast %65 : vector<1x64xf32> to vector<8x64xf32>
    %67 = arith.addf %64, %66 : vector<8x64xf32>
    %cst_37 = arith.constant 5.000000e-01 : f32
    %68 = vector.broadcast %cst_37 : f32 to vector<8x64xf32>
    %69 = arith.mulf %67, %68 : vector<8x64xf32>
    %cst_38 = arith.constant 0.707106769 : f32
    %70 = vector.broadcast %cst_38 : f32 to vector<8x64xf32>
    %71 = arith.mulf %67, %70 : vector<8x64xf32>
    %72 = math.erf %71 : vector<8x64xf32>
    %cst_39 = arith.constant 1.000000e+00 : f32
    %73 = vector.broadcast %cst_39 : f32 to vector<8x64xf32>
    %74 = arith.addf %73, %72 : vector<8x64xf32>
    %75 = arith.mulf %69, %74 : vector<8x64xf32>
    %c0_40 = arith.constant 0 : index
    %c0_41 = arith.constant 0 : index
    %76 = vector.load %arg11[%c0_40, %c0_41] : memref<64x32xf32, #tpu.memory_space<vmem>>, vector<64x32xf32>
    %cst_42 = arith.constant dense<0.000000e+00> : vector<8x32xf32>
    %77 = tpu.matmul %75, %76, %cst_42 {dimension_numbers = #tpu.dot_dimension_numbers<[1], [0], [0], [1], [0, 0, 1, 1], [], []>} : vector<8x64xf32>, vector<64x32xf32>, vector<8x32xf32> -> vector<8x32xf32>
    %c0_43 = arith.constant 0 : index
    %c0_44 = arith.constant 0 : index
    %78 = vector.load %arg12[%c0_43, %c0_44] : memref<1x32xf32, #tpu.memory_space<vmem>>, vector<1x32xf32>
    %79 = vector.broadcast %78 : vector<1x32xf32> to vector<8x32xf32>
    %80 = arith.addf %77, %79 : vector<8x32xf32>
    %81 = arith.addf %80, %62 : vector<8x32xf32>
    %c0_45 = arith.constant 0 : index
    %c0_46 = arith.constant 0 : index
    %82 = vector.load %arg13[%c0_45, %c0_46] : memref<1x32xf32, #tpu.memory_space<vmem>>, vector<1x32xf32>
    %c0_47 = arith.constant 0 : index
    %c0_48 = arith.constant 0 : index
    %83 = vector.load %arg14[%c0_47, %c0_48] : memref<1x32xf32, #tpu.memory_space<vmem>>, vector<1x32xf32>
    %cst_49 = arith.constant dense<0.000000e+00> : vector<8xf32>
    %84 = vector.multi_reduction <add>, %81, %cst_49 [1] : vector<8x32xf32> to vector<8xf32>
    %85 = vector.shape_cast %84 : vector<8xf32> to vector<8x1xf32>
    %cst_50 = arith.constant 3.200000e+01 : f32
    %86 = vector.broadcast %cst_50 : f32 to vector<8x1xf32>
    %87 = arith.divf %85, %86 : vector<8x1xf32>
    %88 = vector.broadcast %87 : vector<8x1xf32> to vector<8x32xf32>
    %89 = arith.subf %81, %88 : vector<8x32xf32>
    %90 = arith.mulf %89, %89 : vector<8x32xf32>
    %cst_51 = arith.constant dense<0.000000e+00> : vector<8xf32>
    %91 = vector.multi_reduction <add>, %90, %cst_51 [1] : vector<8x32xf32> to vector<8xf32>
    %92 = vector.shape_cast %91 : vector<8xf32> to vector<8x1xf32>
    %cst_52 = arith.constant 3.200000e+01 : f32
    %93 = vector.broadcast %cst_52 : f32 to vector<8x1xf32>
    %94 = arith.divf %92, %93 : vector<8x1xf32>
    %cst_53 = arith.constant 9.99999974E-6 : f32
    %95 = vector.broadcast %cst_53 : f32 to vector<8x1xf32>
    %96 = arith.addf %94, %95 : vector<8x1xf32>
    %97 = math.rsqrt %96 : vector<8x1xf32>
    %98 = vector.broadcast %97 : vector<8x1xf32> to vector<8x32xf32>
    %99 = arith.mulf %89, %98 : vector<8x32xf32>
    %100 = vector.broadcast %82 : vector<1x32xf32> to vector<8x32xf32>
    %101 = arith.mulf %100, %99 : vector<8x32xf32>
    %102 = vector.broadcast %83 : vector<1x32xf32> to vector<8x32xf32>
    %103 = arith.addf %101, %102 : vector<8x32xf32>
    %c0_54 = arith.constant 0 : index
    %c0_55 = arith.constant 0 : index
    %c0_56 = arith.constant 0 : index
    %104 = vector.load %arg15[%c0_54, %c0_55, %c0_56] : memref<1x8x32xf32, #tpu.memory_space<vmem>>, vector<1x8x32xf32>
    %105 = vector.shape_cast %104 : vector<1x8x32xf32> to vector<8x32xf32>
    %106 = vector.shape_cast %103 : vector<8x32xf32> to vector<1x8x32xf32>
    tpu.vector_store %arg15[%c0_54, %c0_55, %c0_56], %106 {strides = array<i32>} : memref<1x8x32xf32, #tpu.memory_space<vmem>>, vector<1x8x32xf32>,
    return
  }
  func.func @transform_0(%arg0: i32) -> (i32, i32, i32) {
    %c0_i32 = arith.constant 0 : i32
    %c0_i32_0 = arith.constant 0 : i32
    %c0_i32_1 = arith.constant 0 : i32
    return %arg0, %c0_i32, %c0_i32_0 : i32, i32, i32
  }
  func.func @transform_1(%arg0: i32) -> (i32, i32, i32) {
    %c0_i32 = arith.constant 0 : i32
    %c0_i32_0 = arith.constant 0 : i32
    %c0_i32_1 = arith.constant 0 : i32
    return %arg0, %c0_i32, %c0_i32_0 : i32, i32, i32
  }
  func.func @transform_2(%arg0: i32) -> (i32, i32, i32) {
    %c0_i32 = arith.constant 0 : i32
    %c0_i32_0 = arith.constant 0 : i32
    %c0_i32_1 = arith.constant 0 : i32
    %c0_i32_2 = arith.constant 0 : i32
    return %c0_i32, %c0_i32_0, %c0_i32_1 : i32, i32, i32
  }
  func.func @transform_3(%arg0: i32) -> (i32, i32, i32) {
    %c0_i32 = arith.constant 0 : i32
    %c0_i32_0 = arith.constant 0 : i32
    %c0_i32_1 = arith.constant 0 : i32
    %c0_i32_2 = arith.constant 0 : i32
    return %c0_i32, %c0_i32_0, %c0_i32_1 : i32, i32, i32
  }
  func.func @transform_4(%arg0: i32) -> (i32, i32, i32) {
    %c0_i32 = arith.constant 0 : i32
    %c0_i32_0 = arith.constant 0 : i32
    %c0_i32_1 = arith.constant 0 : i32
    %c0_i32_2 = arith.constant 0 : i32
    return %c0_i32, %c0_i32_0, %c0_i32_1 : i32, i32, i32
  }
  func.func @transform_5(%arg0: i32) -> (i32, i32) {
    %c0_i32 = arith.constant 0 : i32
    %c0_i32_0 = arith.constant 0 : i32
    %c0_i32_1 = arith.constant 0 : i32
    return %c0_i32, %c0_i32_0 : i32, i32
  }
  func.func @transform_6(%arg0: i32) -> (i32, i32) {
    %c0_i32 = arith.constant 0 : i32
    %c0_i32_0 = arith.constant 0 : i32
    %c0_i32_1 = arith.constant 0 : i32
    return %c0_i32, %c0_i32_0 : i32, i32
  }
  func.func @transform_7(%arg0: i32) -> (i32, i32) {
    %c0_i32 = arith.constant 0 : i32
    %c0_i32_0 = arith.constant 0 : i32
    %c0_i32_1 = arith.constant 0 : i32
    return %c0_i32, %c0_i32_0 : i32, i32
  }
  func.func @transform_8(%arg0: i32) -> (i32, i32) {
    %c0_i32 = arith.constant 0 : i32
    %c0_i32_0 = arith.constant 0 : i32
    %c0_i32_1 = arith.constant 0 : i32
    return %c0_i32, %c0_i32_0 : i32, i32
  }
  func.func @transform_9(%arg0: i32) -> (i32, i32) {
    %c0_i32 = arith.constant 0 : i32
    %c0_i32_0 = arith.constant 0 : i32
    %c0_i32_1 = arith.constant 0 : i32
    return %c0_i32, %c0_i32_0 : i32, i32
  }
  func.func @transform_10(%arg0: i32) -> (i32, i32) {
    %c0_i32 = arith.constant 0 : i32
    %c0_i32_0 = arith.constant 0 : i32
    %c0_i32_1 = arith.constant 0 : i32
    return %c0_i32, %c0_i32_0 : i32, i32
  }
  func.func @transform_11(%arg0: i32) -> (i32, i32) {
    %c0_i32 = arith.constant 0 : i32
    %c0_i32_0 = arith.constant 0 : i32
    %c0_i32_1 = arith.constant 0 : i32
    return %c0_i32, %c0_i32_0 : i32, i32
  }
  func.func @transform_12(%arg0: i32) -> (i32, i32) {
    %c0_i32 = arith.constant 0 : i32
    %c0_i32_0 = arith.constant 0 : i32
    %c0_i32_1 = arith.constant 0 : i32
    return %c0_i32, %c0_i32_0 : i32, i32
  }
  func.func @transform_13(%arg0: i32) -> (i32, i32) {
    %c0_i32 = arith.constant 0 : i32
    %c0_i32_0 = arith.constant 0 : i32
    %c0_i32_1 = arith.constant 0 : i32
    return %c0_i32, %c0_i32_0 : i32, i32
  }
  func.func @transform_14(%arg0: i32) -> (i32, i32, i32) {
    %c0_i32 = arith.constant 0 : i32
    %c0_i32_0 = arith.constant 0 : i32
    %c0_i32_1 = arith.constant 0 : i32
    return %arg0, %c0_i32, %c0_i32_0 : i32, i32, i32
  }
}

</mosaic_0001>

<bundles_post_ra>
// kernel: bert_layer.1
= control target key start
LH: loop header
LB: loop body
LE: loop exit
PB: predicated region body
PF: predicated region fallthrough
CT: control target
= control target key end

     0   :  { %19 = vsyncpa [#allocation3], 0  ;;  %s3944_s0 = inlined_call_operand.vmem [shape: f32[2,8,32], index: 0, kind: input, shape index: {}]   ;;  %s3945_s1 = inlined_call_operand.vmem [shape: f32[2,8,8], index: 1, kind: input, shape index: {}]   ;;  %s3946_s2 = inlined_call_operand.vmem [shape: f32[12,32,8], index: 2, kind: input, shape index: {}]   ;;  %s3947_s3 = inlined_call_operand.vmem [shape: f32[12,1,8], index: 3, kind: input, shape index: {}]   ;;  %s3948_s4 = inlined_call_operand.vmem [shape: f32[4,8,32], index: 4, kind: input, shape index: {}]   ;;  %s3949_s5 = inlined_call_operand.vmem [shape: f32[1,32], index: 5, kind: input, shape index: {}]   ;;  %s3950_s6 = inlined_call_operand.vmem [shape: f32[1,32], index: 6, kind: input, shape index: {}]   ;;  %s3951_s7 = inlined_call_operand.vmem [shape: f32[1,32], index: 7, kind: input, shape index: {}]   ;;  %s3952_s8 = inlined_call_operand.vmem [shape: f32[32,64], index: 8, kind: input, shape index: {}]   ;;  %s3953_s9 = inlined_call_operand.vmem [shape: f32[1,64], index: 9, kind: input, shape index: {}]   ;;  %s3954_s10 = inlined_call_operand.vmem [shape: f32[64,32], index: 10, kind: input, shape index: {}]   ;;  %s3955_s11 = inlined_call_operand.vmem [shape: f32[1,32], index: 11, kind: input, shape index: {}]   ;;  %s3956_s12 = inlined_call_operand.vmem [shape: f32[1,32], index: 12, kind: input, shape index: {}]   ;;  %s3957_s13 = inlined_call_operand.vmem [shape: f32[1,32], index: 13, kind: input, shape index: {}]   ;;  %s3958_s14 = inlined_call_operand.hbm [shape: f32[2,8,32], index: 14, kind: output, shape index: {}]  }
   0x1   :  { %21 = vsyncpa [#allocation3 + $0x1], 0  ;;  %s3424_s29 = smov 0   ;;  %s3426_s30 = smov 0  }
   0x2   :  { %s3428_s15 = smov 0   ;;  %s3430_s16 = smov 0  }
   0x3 LB: > { %3964 = sst [smem:[#allocation5_spill]] %s3331_s29  ;;  %s3445_s17 = sadd.s32 4294967295, %s3343_s16   ;;  %s3343_s16 = sphi %s3430_s16, %s3973_s16   ;;  %s3339_s15 = sphi %s3428_s15, %s3975_s15   ;;  %s3335_s30 = sphi %s3426_s30, %s3977_s30   ;;  %s3331_s29 = sphi %s3424_s29, %s3976_s29  }
   0x4   : > { %3965 = sst [smem:[#allocation6_spill]] %s3339_s15  ;;  %s2747_s18 = sadd.s32 4294967294, %s3343_s16  }
   0x5   : > { %s3449_s19 = sadd.s32 1, %s3343_s16   ;;  %s338_s20 = sadd.s32 1, %s3339_s15 }
   0x6   : > { %3966 = sst [smem:[#allocation7_spill]] %s3449_s19  ;;  %s335_s21 = ssub.s32 %s3343_s16, %s3449_s19 }
   0x7   : > { %p348_p0 = scmp.ne.s32.totalorder %s3339_s15, %s3335_s30  ;;  %p336_p1 = scmp.eq.s32.totalorder %s335_s21, 0 }
   0x8   : > { %p349_p2 = scmp.eq.s32.totalorder %s3445_s17, 1  ;;  %p354_p3 = scmp.ne.s32.totalorder %s3335_s30, %s3331_s29 }
   0x9   : > { %p355_p4 = scmp.eq.s32.totalorder %s2747_s18, 1  ;;  %p2750_p7 = scmp.ge.s32.totalorder %s3343_s16, 1 }
   0xa   : > { %s3460_s22 = scalar_select %p336_p1, %s3339_s15, %s338_s20  }
   0xb   : > { %p3462_p5 = por %p349_p2, %p348_p0  ;;  %p3466_p6 = por %p355_p4, %p354_p3 }
   0xc   : > { %3967 = sst [smem:[#allocation8_spill]] %s3460_s22  ;;  %p423_p8 = scmp.lt.s32.totalorder %s3343_s16, 3 }
   0xd   : > { %s3969_s24 = scalar_select %p3466_p6, 1, 0 }
   0xe   : > { %p424_p9 = pnand %p2750_p7, %p423_p8 }
   0xf   : > { %3970 = sst [smem:[#allocation9_spill]] %s3969_s24  ;;  %v482_v0 = vld [vmem:[%s3946_s2] sm:$0xff] (!%p424_p9)  ;;  %v483_v1 = vld [vmem:[%s3946_s2 + $0x8] sm:$0xff] (!%p424_p9)  ;;  %v3345_v3 = vmov (!%p424_p9), 0.0|0.0   ;;  %v484_v6 = vld [vmem:[%s3946_s2 + $0x10] sm:$0xff] (!%p424_p9)  ;;  %p472_p10 = scmp.lt.s32.totalorder (!%p424_p9), %s3445_s17, 1 }
  0x10   : > { %427 = sbr.rel (%p424_p9) target bundleno = 2325 (0x915), region = 76  ;;  %v486_v2 = vld [vmem:[%s3946_s2 + $0x20] sm:$0xff] (!%p424_p9)  ;;  %3127 = vmatprep.subr.bf16.mxu0 (!%p424_p9), %v3345_v3  ;;  %3133 = vmatprep.subr.bf16.mxu1 (!%p424_p9), %v3345_v3  ;;  %v3128_v4 = vpack.c.bf16 (!%p424_p9), %v483_v1, %v482_v0  ;;  %v487_v5 = vld [vmem:[%s3946_s2 + $0x28] sm:$0xff] (!%p424_p9)  ;;  %v485_v7 = vld [vmem:[%s3946_s2 + $0x18] sm:$0xff] (!%p424_p9)  ;;  %vm3346_vm0 = vmmov (!%p424_p9), 0   ;;  %v3347_v11 = vmov (!%p424_p9), 0.0  }
  0x11   : > { %v3134_v8 = vpack.c.bf16 (!%p424_p9), %v487_v5, %v486_v2  ;;  %v488_v9 = vld [vmem:[%s3946_s2 + $0x30] sm:$0xff] (!%p424_p9)  ;;  %v489_v10 = vld [vmem:[%s3946_s2 + $0x38] sm:$0xff] (!%p424_p9)  ;;  %2913 = vmatprep.mubr.msk.f32.mxu0 (!%p424_p9), %vm3346_vm0, %v3347_v11  ;;  %2924 = vmatprep.mubr.msk.f32.mxu1 (!%p424_p9), %vm3346_vm0, %v3347_v11  ;;  %v3131_v12 = vpack.c.bf16 (!%p424_p9), %v485_v7, %v484_v6  ;;  %v490_v14 = vld [vmem:[%s3946_s2 + $0x40] sm:$0xff] (!%p424_p9)  ;;  %vm614_vm1 = vcmask (!%p424_p9), 261120   ;;  %vm1458_vm2 = vcmask (!%p424_p9), 64512   ;;  %s469_s27 = sand.u32 (!%p424_p9), 1, %s3335_s30  }
  0x12   : > { %3129 = vmatpush3.bf16.msra.mxu0 (!%p424_p9), %v3128_v4  ;;  %v3137_v13 = vpack.c.bf16 (!%p424_p9), %v489_v10, %v488_v9  ;;  %v491_v15 = vld [vmem:[%s3946_s2 + $0x48] sm:$0xff] (!%p424_p9)  ;;  %v494_v16 = vld [vmem:[%s3946_s2 + $0x60] sm:$0xff] (!%p424_p9)  ;;  %v492_v21 = vld [vmem:[%s3946_s2 + $0x50] sm:$0xff] (!%p424_p9)  ;;  %vm2557_vm3 = vcmask (!%p424_p9), 523264   ;;  %s2804_s18 = sshll.u32 (!%p424_p9), %s3445_s17, 7 }
  0x13   : > { %3135 = vmatpush3.bf16.msra.mxu1 (!%p424_p9), %v3134_v8  ;;  %3130 = vmatprep.subr.bf16.mxu0 (!%p424_p9), %v3345_v3  ;;  %v495_v17 = vld [vmem:[%s3946_s2 + $0x68] sm:$0xff] (!%p424_p9)  ;;  %v3140_v19 = vpack.c.bf16 (!%p424_p9), %v491_v15, %v490_v14  ;;  %v493_v22 = vld [vmem:[%s3946_s2 + $0x58] sm:$0xff] (!%p424_p9)  ;;  %v496_v23 = vld [vmem:[%s3946_s2 + $0x70] sm:$0xff] (!%p424_p9)  ;;  %s3901_s25 = scalar_lea.hbm (!%p424_p9), %s3958_s14, %s2804_s18 }
  0x14   : > { %3136 = vmatprep.subr.bf16.mxu1 (!%p424_p9), %v3345_v3  ;;  %v3146_v20 = vpack.c.bf16 (!%p424_p9), %v495_v17, %v494_v16  ;;  %v497_v24 = vld [vmem:[%s3946_s2 + $0x78] sm:$0xff] (!%p424_p9)  ;;  %v3143_v25 = vpack.c.bf16 (!%p424_p9), %v493_v22, %v492_v21  ;;  %v498_v27 = vld [vmem:[%s3946_s2 + $0x80] sm:$0xff] (!%p424_p9)  ;;  %v499_v28 = vld [vmem:[%s3946_s2 + $0x88] sm:$0xff] (!%p424_p9) }
  0x15   : > { %v3149_v26 = vpack.c.bf16 (!%p424_p9), %v497_v24, %v496_v23  ;;  %v502_v29 = vld [vmem:[%s3946_s2 + $0xa0] sm:$0xff] (!%p424_p9)  ;;  %v503_v30 = vld [vmem:[%s3946_s2 + $0xa8] sm:$0xff] (!%p424_p9)  ;;  %v3152_v31 = vpack.c.bf16 (!%p424_p9), %v499_v28, %v498_v27  ;;  %v500_v33 = vld [vmem:[%s3946_s2 + $0x90] sm:$0xff] (!%p424_p9) }
  0x16   : > { %3132 = vmatpush3.bf16.msra.mxu0 (!%p424_p9), %v3131_v12  ;;  %v3158_v32 = vpack.c.bf16 (!%p424_p9), %v503_v30, %v502_v29  ;;  %v501_v34 = vld [vmem:[%s3946_s2 + $0x98] sm:$0xff] (!%p424_p9)  ;;  %v504_v35 = vld [vmem:[%s3946_s2 + $0xb0] sm:$0xff] (!%p424_p9)  ;;  %v506_v39 = vld [vmem:[%s3946_s2 + $0xc0] sm:$0xff] (!%p424_p9) }
  0x17   : > { %s3504_s22 = scalar_select %p472_p10, %s3445_s17, 1  ;;  %3138 = vmatpush3.bf16.msra.mxu1 %v3137_v13  ;;  %3139 = vmatprep.subr.bf16.mxu0 %v3345_v3  ;;  %v505_v36 = vld [vmem:[%s3946_s2 + $0xb8] sm:$0xff]  ;;  %v3155_v37 = vpack.c.bf16 %v501_v34, %v500_v33  ;;  %v507_v40 = vld [vmem:[%s3946_s2 + $0xc8] sm:$0xff]  ;;  %v510_v41 = vld [vmem:[%s3946_s2 + $0xe0] sm:$0xff] }
  0x18   : > { %3145 = vmatprep.subr.bf16.mxu1 %v3345_v3  ;;  %v3161_v38 = vpack.c.bf16 %v505_v36, %v504_v35  ;;  %v511_v42 = vld [vmem:[%s3946_s2 + $0xe8] sm:$0xff]  ;;  %v3164_v43 = vpack.c.bf16 %v507_v40, %v506_v39  ;;  %v508_v45 = vld [vmem:[%s3946_s2 + $0xd0] sm:$0xff]  ;;  %v509_v46 = vld [vmem:[%s3946_s2 + $0xd8] sm:$0xff]  ;;  %s3348_s17 = smov [#allocation2]  }
  0x19   : > { %s2752_s26 = sshll.u32 %s3504_s22, 3  ;;  %v3170_v44 = vpack.c.bf16 %v511_v42, %v510_v41  ;;  %v512_v47 = vld [vmem:[%s3946_s2 + $0xf0] sm:$0xff]  ;;  %v513_v48 = vld [vmem:[%s3946_s2 + $0xf8] sm:$0xff]  ;;  %v3167_v49 = vpack.c.bf16 %v509_v46, %v508_v45  ;;  %v514_v51 = vld [vmem:[%s3946_s2 + $0x100] sm:$0xff]  ;;  %s2663_s22 = scalar_lea.sflag [#allocation3], %s469_s27 }
  0x1a   : > { %s475_s15 = scalar_lea.vmem %s3944_s0, %s2752_s26  ;;  %v3173_v50 = vpack.c.bf16 %v513_v48, %v512_v47  ;;  %v515_v52 = vld [vmem:[%s3946_s2 + $0x108] sm:$0xff]  ;;  %v516_v54 = vld [vmem:[%s3946_s2 + $0x110] sm:$0xff]  ;;  %v517_v55 = vld [vmem:[%s3946_s2 + $0x118] sm:$0xff]  ;;  %s479_s29 = scalar_lea.vmem %s3945_s1, %s2752_s26 }
  0x1b   : > { %v3526_v18 = vld [vmem:[%s475_s15] sm:$0xff]  ;;  %v3176_v53 = vpack.c.bf16 %v515_v52, %v514_v51  ;;  %v3179_v56 = vpack.c.bf16 %v517_v55, %v516_v54  ;;  %v519_v58 = vld [vmem:[%s3946_s2 + $0x128] sm:$0xff]  ;;  %v520_v63 = vld [vmem:[%s3946_s2 + $0x130] sm:$0xff] }
  0x1c   : > { %2914 = vmatmul.mubr.msk.f32.vlgmr.msra.gmra.mrb[0].mxu0 %vm614_vm1, %v3526_v18  ;;  %2925 = vmatmul.mubr.msk.f32.vlgmr.msra.gmra.mrb[0].mxu1 %vm614_vm1, %v3526_v18  ;;  %v518_v57 = vld [vmem:[%s3946_s2 + $0x120] sm:$0xff]  ;;  %v523_v61 = vld [vmem:[%s3946_s2 + $0x148] sm:$0xff]  ;;  %v521_v0 = vld [vmem:[%s3946_s2 + $0x138] sm:$0xff] }
  0x1d   : > { %3141 = vmatpush3.bf16.msra.mxu0 %v3140_v19  ;;  %3147 = vmatpush3.bf16.msra.mxu1 %v3146_v20  ;;  %v522_v59 = vld [vmem:[%s3946_s2 + $0x140] sm:$0xff]  ;;  %v3182_v60 = vpack.c.bf16 %v519_v58, %v518_v57  ;;  %v524_v1 = vld [vmem:[%s3946_s2 + $0x150] sm:$0xff]  ;;  %v3185_v2 = vpack.c.bf16 %v521_v0, %v520_v63  ;;  %v525_v4 = vld [vmem:[%s3946_s2 + $0x158] sm:$0xff] }
  0x1e   : > { %3142 = vmatprep.subr.bf16.mxu0 %v3345_v3  ;;  %3148 = vmatprep.subr.bf16.mxu1 %v3345_v3  ;;  %v3188_v62 = vpack.c.bf16 %v523_v61, %v522_v59  ;;  %v3191_v5 = vpack.c.bf16 %v525_v4, %v524_v1  ;;  %v526_v6 = vld [vmem:[%s3946_s2 + $0x160] sm:$0xff]  ;;  %v527_v7 = vld [vmem:[%s3946_s2 + $0x168] sm:$0xff]  ;;  %v528_v9 = vld [vmem:[%s3946_s2 + $0x170] sm:$0xff] }
  0x1f   : > { %2935 = vmatprep.mubr.msk.f32.mxu0 %vm3346_vm0, %v3347_v11  ;;  %2946 = vmatprep.mubr.msk.f32.mxu1 %vm3346_vm0, %v3347_v11  ;;  %v3194_v8 = vpack.c.bf16 %v527_v7, %v526_v6  ;;  %v529_v10 = vld [vmem:[%s3946_s2 + $0x178] sm:$0xff]  ;;  %v2758_v22 = vld [vmem:[%s3947_s3 + $0x4] ss:$0 sm:$0xff]  ;;  %v2759_v24 = vld [vmem:[%s3947_s3 + $0x5] ss:$0 sm:$0xff] }
  0x20   : > { %v3197_v12 = vpack.c.bf16 %v529_v10, %v528_v9  ;;  %v2760_v33 = vld [vmem:[%s3947_s3 + $0x6] ss:$0 sm:$0xff]  ;;  %v2761_v34 = vld [vmem:[%s3947_s3 + $0x7] ss:$0 sm:$0xff]  ;;  %v2757_v41 = vld [vmem:[%s3947_s3 + $0x3] ss:$0 sm:$0xff] }
  0x21   : > { %3144 = vmatpush3.bf16.msra.mxu0 %v3143_v25  ;;  %3150 = vmatpush3.bf16.msra.mxu1 %v3149_v26  ;;  %v2754_v25 = vld [vmem:[%s3947_s3] ss:$0 sm:$0xff]  ;;  %v2762_v46 = vld [vmem:[%s3947_s3 + $0x8] ss:$0 sm:$0xff] }
  0x22   : > { %3151 = vmatprep.subr.bf16.mxu0 %v3345_v3  ;;  %3157 = vmatprep.subr.bf16.mxu1 %v3345_v3  ;;  %v481_v58 = vld [vmem:[%s479_s29] sm:$0xff]  ;;  %s2751_s29 = sshll.u32 %s469_s27, 3 }
  0x23   : > { %s471_s20 = scalar_lea.vmem [#allocation2], %s2751_s29  ;;  %s3285_s29 = sshll.u32 %s3348_s17, 4  ;;  %s3286_s29 = int_to_ptr.vmem [resolvable:$false] %s3285_s29 }
  0x24   : > { %2936 = vmatmul.mubr.msk.f32.vlgmr.msra.gmra.mrb[2].mxu0 %vm614_vm1, %v3526_v18  ;;  %2947 = vmatmul.mubr.msk.f32.vlgmr.msra.gmra.mrb[2].mxu1 %vm614_vm1, %v3526_v18  ;;  %s2676_s15 = sshll.u32 %s471_s20, 4  ;;  %s3287_s24 = scalar_lea.vmem %s3286_s29, 256  ;;  %s3903_s15 = int_to_ptr.vmem [resolvable:$true] %s2676_s15 }
  0x25   : > { %3153 = vmatpush3.bf16.msra.mxu0 %v3152_v31  ;;  %3159 = vmatpush3.bf16.msra.mxu1 %v3158_v32  ;;  %v2755_v32 = vld [vmem:[%s3947_s3 + $0x1] ss:$0 sm:$0xff]  ;;  %s3281_s26 = scalar_lea.vmem %s3903_s15, 128  ;;  %p3288_p0 = scmp.lt.s32.totalorder %s3903_s15, %s3286_s29 }
  0x26   : > { %3154 = vmatprep.subr.bf16.mxu0 %v3345_v3  ;;  %3160 = vmatprep.subr.bf16.mxu1 %v3345_v3  ;;  %p3282_p11 = scmp.ne.s32.totalorder %s3903_s15, %s3281_s26  ;;  %p3289_p1 = scmp.lt.s32.totalorder %s3287_s24, %s3281_s26 }
  0x27   : > { %2957 = vmatprep.mubr.msk.f32.mxu0 %vm3346_vm0, %v3347_v11  ;;  %2968 = vmatprep.mubr.msk.f32.mxu1 %vm3346_vm0, %v3347_v11 }
  0x28   : > { %p3283_p12 = pnand %p3282_p11, %p3462_p5  ;;  %p3290_p2 = por %p3289_p1, %p3288_p0 }
  0x29   : > { %3156 = vmatpush3.bf16.msra.mxu0 %v3155_v37  ;;  %3162 = vmatpush3.bf16.msra.mxu1 %v3161_v38  ;;  %v2756_v37 = vld [vmem:[%s3947_s3 + $0x2] ss:$0 sm:$0xff] }
  0x2a   : > { %3163 = vmatprep.subr.bf16.mxu0 %v3345_v3  ;;  %3169 = vmatprep.subr.bf16.mxu1 %v3345_v3  ;;  %p3284_p13 = pneg %p3283_p12 }
  0x2c   : > { %2958 = vmatmul.mubr.msk.f32.vlgmr.msra.gmra.mrb[4].mxu0 %vm614_vm1, %v3526_v18  ;;  %2969 = vmatmul.mubr.msk.f32.vlgmr.msra.gmra.mrb[4].mxu1 %vm614_vm1, %v3526_v18  ;;  %p3291_p3 = pnand %p3290_p2, %p3284_p13 }
  0x2d   : > { %3165 = vmatpush3.bf16.msra.mxu0 %v3164_v43  ;;  %3171 = vmatpush3.bf16.msra.mxu1 %v3170_v44 }
  0x2e   : > { %3166 = vmatprep.subr.bf16.mxu0 %v3345_v3  ;;  %3172 = vmatprep.subr.bf16.mxu1 %v3345_v3 }
  0x2f   : > { %2979 = vmatprep.mubr.msk.f32.mxu0 %vm3346_vm0, %v3347_v11  ;;  %2990 = vmatprep.mubr.msk.f32.mxu1 %vm3346_vm0, %v3347_v11 }
  0x31   : > { %3168 = vmatpush3.bf16.msra.mxu0 %v3167_v49  ;;  %3174 = vmatpush3.bf16.msra.mxu1 %v3173_v50  ;;  %v2763_v50 = vld [vmem:[%s3947_s3 + $0x9] ss:$0 sm:$0xff] }
  0x32   : > { %3175 = vmatprep.subr.bf16.mxu0 %v3345_v3  ;;  %3181 = vmatprep.subr.bf16.mxu1 %v3345_v3 }
  0x34   : > { %2980 = vmatmul.mubr.msk.f32.vlgmr.msra.gmra.mrb[6].mxu0 %vm614_vm1, %v3526_v18  ;;  %2991 = vmatmul.mubr.msk.f32.vlgmr.msra.gmra.mrb[6].mxu1 %vm614_vm1, %v3526_v18 }
  0x35   : > { %3177 = vmatpush3.bf16.msra.mxu0 %v3176_v53  ;;  %3001 = vmatprep.mubr.msk.f32.mxu0 %vm3346_vm0, %v3347_v11 }
  0x36   : > { %3178 = vmatprep.subr.bf16.mxu0 %v3345_v3  ;;  %3012 = vmatprep.mubr.msk.f32.mxu1 %vm3346_vm0, %v3347_v11 }
  0x37   : > { %3183 = vmatpush3.bf16.msra.mxu1 %v3182_v60 }
  0x38   : > { %3184 = vmatprep.subr.bf16.mxu1 %v3345_v3 }
  0x39   : > { %3180 = vmatpush3.bf16.msra.mxu0 %v3179_v56 }
  0x3a   : > { %3187 = vmatprep.subr.bf16.mxu0 %v3345_v3 }
  0x3b   : > { %3186 = vmatpush3.bf16.msra.mxu1 %v3185_v2 }
  0x3c   : > { %3002 = vmatmul.mubr.msk.f32.vlgmr.msra.gmra.mrb[8].mxu0 %vm614_vm1, %v3526_v18  ;;  %3193 = vmatprep.subr.bf16.mxu1 %v3345_v3 }
  0x3d   : > { %3189 = vmatpush3.bf16.msra.mxu0 %v3188_v62  ;;  %3023 = vmatprep.mubr.msk.f32.mxu0 %vm3346_vm0, %v3347_v11 }
  0x3e   : > { %3190 = vmatprep.subr.bf16.mxu0 %v3345_v3  ;;  %3013 = vmatmul.mubr.msk.f32.vlgmr.msra.gmra.mrb[8].mxu1 %vm614_vm1, %v3526_v18 }
  0x3f   : > { %3195 = vmatpush3.bf16.msra.mxu1 %v3194_v8  ;;  %3034 = vmatprep.mubr.msk.f32.mxu1 %vm3346_vm0, %v3347_v11 }
  0x40   : > { %3196 = vmatprep.subr.bf16.mxu1 %v3345_v3 }
  0x41   : > { %3192 = vmatpush3.bf16.msra.mxu0 %v3191_v5 }
  0x42   : > { %3037 = vmatprep.subr.mxu0 %v3347_v11 }
  0x43   : > { %3198 = vmatpush3.bf16.msra.mxu1 %v3197_v12 }
  0x44   : > { %3024 = vmatmul.mubr.msk.f32.vlgmr.msra.gmra.mrb[10].mxu0 %vm614_vm1, %v3526_v18  ;;  %3052 = vmatprep.subr.mxu1 %v3347_v11 }
  0x45   : > { %3039 = vmatprep.mubr.msk.f32.mxu0 %vm3346_vm0, %v3347_v11 }
  0x46   : > { %3035 = vmatmul.mubr.msk.f32.vlgmr.msra.gmra.mrb[10].mxu1 %vm614_vm1, %v3526_v18 }
  0x47   : > { %3054 = vmatprep.mubr.msk.f32.mxu1 %vm3346_vm0, %v3347_v11 }
  0xef   : > { %v684_v13 = vpop.f32.mrb[0].mxu0  ;;  %v754_v15 = vpop.f32.mrb[0].mxu1 }
  0xf0   : > { %v2915_v14 = vpop.f32.mrb[1].mxu0  ;;  %v2926_v16 = vpop.f32.mrb[1].mxu1  ;;  %v685_v31 = vadd.f32 %v2754_v25, %v684_v13  ;;  %v755_v35 = vadd.f32 %v2755_v32, %v754_v15 }
  0xf7   : > { %v824_v17 = vpop.f32.mrb[2].mxu0  ;;  %v894_v20 = vpop.f32.mrb[2].mxu1 }
  0xf8   : > { %v2937_v19 = vpop.f32.mrb[3].mxu0  ;;  %v2948_v21 = vpop.f32.mrb[3].mxu1  ;;  %v825_v44 = vadd.f32 %v2756_v37, %v824_v17  ;;  %v895_v45 = vadd.f32 %v2757_v41, %v894_v20 }
  0xff   : > { %v964_v23 = vpop.f32.mrb[4].mxu0  ;;  %v1034_v28 = vpop.f32.mrb[4].mxu1 }
 0x100   : > { %v965_v26 = vadd.f32 %v2758_v22, %v964_v23  ;;  %v2959_v27 = vpop.f32.mrb[5].mxu0  ;;  %v2970_v29 = vpop.f32.mrb[5].mxu1  ;;  %v1035_v30 = vadd.f32 %v2759_v24, %v1034_v28 }
 0x102   : > { %3038 = vmatpush3.xpose.msk.msra.mxu0 %vm1458_vm2, %v965_v26 }
 0x103   : > { %3042 = vmatprep.subr.mxu0 %v3347_v11 }
 0x105   : > { %3040 = vmatmul.mubr.msk.f32.vlgmr.msra.gmra.mrb[12].mxu0 %vm1458_vm2, %v685_v31 }
 0x106   : > { %3043 = vmatpush3.xpose.msk.msra.mxu0 %vm1458_vm2, %v1035_v30  ;;  %3044 = vmatprep.mubr.msk.f32.mxu0 %vm3346_vm0, %v3347_v11 }
 0x107   : > { %v1104_v36 = vpop.f32.mrb[6].mxu0  ;;  %3047 = vmatprep.subr.mxu0 %v3347_v11  ;;  %v1174_v39 = vpop.f32.mrb[6].mxu1 }
 0x108   : > { %v1105_v38 = vadd.f32 %v2760_v33, %v1104_v36  ;;  %v2981_v40 = vpop.f32.mrb[7].mxu0  ;;  %v1175_v42 = vadd.f32 %v2761_v34, %v1174_v39  ;;  %v2992_v43 = vpop.f32.mrb[7].mxu1 }
 0x109   : > { %3045 = vmatmul.mubr.msk.f32.vlgmr.msra.gmra.mrb[14].mxu0 %vm1458_vm2, %v755_v35 }
 0x10a   : > { %3048 = vmatpush3.xpose.msk.msra.mxu0 %vm1458_vm2, %v1105_v38  ;;  %3049 = vmatprep.mubr.msk.f32.mxu0 %vm3346_vm0, %v3347_v11 }
 0x10b   : > { %3053 = vmatpush3.xpose.msk.msra.mxu1 %vm1458_vm2, %v1175_v42  ;;  %3057 = vmatprep.subr.mxu0 %v3347_v11  ;;  %v2764_v42 = vld [vmem:[%s3947_s3 + $0xa] ss:$0 sm:$0xff] }
 0x10c   : > { %3062 = vmatprep.subr.mxu1 %v3347_v11 }
 0x10d   : > { %3050 = vmatmul.mubr.msk.f32.vlgmr.msra.gmra.mrb[16].mxu0 %vm1458_vm2, %v825_v44 }
 0x10e   : > { %3055 = vmatmul.mubr.msk.f32.vlgmr.msra.gmra.mrb[12].mxu1 %vm1458_vm2, %v895_v45  ;;  %3059 = vmatprep.mubr.msk.f32.mxu0 %vm3346_vm0, %v3347_v11 }
 0x10f   : > { %3064 = vmatprep.mubr.msk.f32.mxu1 %vm3346_vm0, %v3347_v11  ;;  %v1244_v47 = vpop.f32.mrb[8].mxu0 }
 0x110   : > { %v1245_v48 = vadd.f32 %v2762_v46, %v1244_v47  ;;  %v3003_v49 = vpop.f32.mrb[9].mxu0 }
 0x111   : > { %v1314_v51 = vpop.f32.mrb[8].mxu1  ;;  %v2765_v49 = vld [vmem:[%s3947_s3 + $0xb] ss:$0 sm:$0xff] }
 0x112   : > { %3058 = vmatpush3.msra.mxu0 %v1245_v48  ;;  %v1315_v52 = vadd.f32 %v2763_v50, %v1314_v51  ;;  %v3014_v53 = vpop.f32.mrb[9].mxu1 }
 0x113   : > { %3067 = vmatprep.subr.mxu0 %v3347_v11 }
 0x114   : > { %3063 = vmatpush3.msra.mxu1 %v1315_v52 }
 0x115   : > { %3072 = vmatprep.subr.mxu1 %v3347_v11 }
 0x117   : > { %v3757_v54 = vpop.f32.mrb[10].mxu0 }
 0x118   : > { %v3025_v55 = vpop.f32.mrb[11].mxu0  ;;  %v1385_v48 = vadd.f32 %v2764_v42, %v3757_v54 }
 0x119   : > { %v3760_v56 = vpop.f32.mrb[10].mxu1 }
 0x11a   : > { %v3036_v57 = vpop.f32.mrb[11].mxu1 }
 0x11b   : > { %v1455_v57 = vadd.f32 %v2765_v49, %v3760_v56  ;;  %v2111_v56 = vld [vmem:[%s3948_s4] sm:$0xff] }
 0x1d8   : > { %v1531_v59 = vpop.f32.mrb[12].mxu0 }
 0x1d9   : > { %v1532_v60 = vadd.f32 %v1531_v59, %v481_v58  ;;  %v3041_v61 = vpop.f32.mrb[13].mxu0 }
 0x1db   : > { %v1763_v62 = vsel %vm1458_vm2, %v1532_v60, -inf }
 0x1dc   : > { %1764 = vmax.xlane.f32.xlu0 %v1763_v62  ;;  %v1607_v63 = vpop.f32.mrb[14].mxu0 }
 0x1dd   : > { %v1608_v0 = vadd.f32 %v1607_v63, %v481_v58  ;;  %v3046_v1 = vpop.f32.mrb[15].mxu0  ;;  %v2112_v63 = vld [vmem:[%s3948_s4 + $0x8] sm:$0xff] }
 0x1df   : > { %v1766_v2 = vsel %vm1458_vm2, %v1608_v0, -inf }
 0x1e0   : > { %1767 = vmax.xlane.f32.xlu0 %v1766_v2  ;;  %v1683_v4 = vpop.f32.mrb[16].mxu0 }
 0x1e1   : > { %v1759_v5 = vpop.f32.mrb[12].mxu1  ;;  %v1684_v6 = vadd.f32 %v1683_v4, %v481_v58  ;;  %v3051_v7 = vpop.f32.mrb[17].mxu0  ;;  %v2114_v4 = vld [vmem:[%s3948_s4 + $0x18] sm:$0xff] }
 0x1e2   : > { %v3056_v8 = vpop.f32.mrb[13].mxu1  ;;  %v1760_v9 = vadd.f32 %v1759_v5, %v481_v58 }
 0x1e3   : > { %v1769_v10 = vsel %vm1458_vm2, %v1684_v6, -inf }
 0x1e4   : > { %1770 = vmax.xlane.f32.xlu1 %v1769_v10  ;;  %v1772_v12 = vsel %vm1458_vm2, %v1760_v9, -inf }
 0x1e8   : > { %1773 = vmax.xlane.f32.xlu1 %v1772_v12 }
 0x269   : > { %v1765_v13 = vpop.xlane.xlu0 %1764 }
 0x26a   : > { %v1775_v14 = vsub.f32 %v1532_v60, %v1765_v13 }
 0x26c   : > { %v1779_v15 = vmul.f32 1.442695, %v1775_v14 }
 0x26d   : > { %v1768_v16 = vpop.xlane.xlu0 %1767 }
 0x26e   : > { %3259 = vpow2.f32 %v1779_v15  ;;  %v1776_v17 = vsub.f32 %v1608_v0, %v1768_v16  ;;  %v2113_v0 = vld [vmem:[%s3948_s4 + $0x10] sm:$0xff] }
 0x270   : > { %v1781_v19 = vmul.f32 1.442695, %v1776_v17 }
 0x271   : > { %v1771_v20 = vpop.xlane.xlu1 %1770 }
 0x272   : > { %3261 = vpow2.f32 %v1781_v19  ;;  %v1777_v21 = vsub.f32 %v1684_v6, %v1771_v20 }
 0x274   : > { %v1783_v22 = vmul.f32 1.442695, %v1777_v21 }
 0x275   : > { %v1774_v23 = vpop.xlane.xlu1 %1773 }
 0x276   : > { %3263 = vpow2.f32 %v1783_v22  ;;  %v1778_v24 = vsub.f32 %v1760_v9, %v1774_v23 }
 0x278   : > { %v3260_v25 = vpop.eup %3259  ;;  %v1785_v26 = vmul.f32 1.442695, %v1778_v24 }
 0x279   : > { %v1787_v27 = vsel %vm1458_vm2, %v3260_v25, 0.0 }
 0x27a   : > { %3265 = vpow2.f32 %v1785_v26  ;;  %1788 = vadd.xlane.f32.xlu0 %v1787_v27 }
 0x27c   : > { %v3262_v28 = vpop.eup %3261 }
 0x27d   : > { %v1790_v29 = vsel %vm1458_vm2, %v3262_v28, 0.0 }
 0x27e   : > { %1791 = vadd.xlane.f32.xlu1 %v1790_v29 }
 0x280   : > { %v3264_v30 = vpop.eup %3263 }
 0x281   : > { %v1793_v31 = vsel %vm1458_vm2, %v3264_v30, 0.0 }
 0x282   : > { %1794 = vadd.xlane.f32.xlu0 %v1793_v31 }
 0x284   : > { %v3266_v32 = vpop.eup %3265 }
 0x285   : > { %v1796_v33 = vsel %vm1458_vm2, %v3266_v32, 0.0 }
 0x286   : > { %1797 = vadd.xlane.f32.xlu1 %v1796_v33 }
 0x307   : > { %v1789_v34 = vpop.xlane.xlu0 %1788 }
 0x308   : > { %3267 = vrcp.f32 %v1789_v34 }
 0x30b   : > { %v1792_v35 = vpop.xlane.xlu1 %1791 }
 0x30c   : > { %3269 = vrcp.f32 %v1792_v35 }
 0x30f   : > { %v1795_v36 = vpop.xlane.xlu0 %1794 }
 0x310   : > { %3271 = vrcp.f32 %v1795_v36 }
 0x312   : > { %v3268_v37 = vpop.eup %3267 }
 0x313   : > { %v1803_v38 = vmul.f32 %v3268_v37, %v1789_v34  ;;  %v1798_v39 = vpop.xlane.xlu1 %1797 }
 0x314   : > { %3273 = vrcp.f32 %v1798_v39 }
 0x315   : > { %v1807_v40 = vsub.f32 2.0, %v1803_v38 }
 0x316   : > { %v3270_v41 = vpop.eup %3269 }
 0x317   : > { %v1811_v43 = vmul.f32 %v3268_v37, %v1807_v40  ;;  %v1804_v44 = vmul.f32 %v3270_v41, %v1792_v35  ;;  %v2454_v37 = vld [vmem:[%s3952_s8 + $0x8] sm:$0xff] }
 0x319   : > { %v1815_v45 = vmul.f32 %v3260_v25, %v1811_v43  ;;  %v1808_v46 = vsub.f32 2.0, %v1804_v44 }
 0x31a   : > { %v3272_v47 = vpop.eup %3271 }
 0x31b   : > { %v1812_v50 = vmul.f32 %v3270_v41, %v1808_v46  ;;  %v1805_v51 = vmul.f32 %v3272_v47, %v1795_v36  ;;  %3060 = vmatmul.mubr.msk.f32.vlgmr.msra.gmra.mrb[18].mxu0 %vm1458_vm2, %v1815_v45  ;;  %v2453_v36 = vld [vmem:[%s3952_s8] sm:$0xff] }
 0x31c   : > { %3068 = vmatpush3.msra.mxu0 %v1385_v48  ;;  %3069 = vmatprep.mubr.msk.f32.mxu0 %vm3346_vm0, %v3347_v11  ;;  %v3200_v38 = vpack.c.bf16 %v2454_v37, %v2453_v36  ;;  %v2795_v45 = vld [vmem:[%s3950_s6] ss:$0 sm:$0xff] }
 0x31d   : > { %v1816_v52 = vmul.f32 %v3262_v28, %v1812_v50  ;;  %v1809_v53 = vsub.f32 2.0, %v1805_v51  ;;  %3077 = vmatprep.subr.mxu0 %v3347_v11  ;;  %v2542_v50 = vld [vmem:[%s3954_s10] sm:$0xff]  ;;  %v2543_v51 = vld [vmem:[%s3954_s10 + $0x8] sm:$0xff] }
 0x31e   : > { %v3274_v55 = vpop.eup %3273 }
 0x31f   : > { %v1813_v54 = vmul.f32 %v3272_v47, %v1809_v53  ;;  %v1806_v58 = vmul.f32 %v3274_v55, %v1798_v39  ;;  %3065 = vmatmul.mubr.msk.f32.vlgmr.msra.gmra.mrb[14].mxu1 %vm1458_vm2, %v1816_v52  ;;  %v2456_v39 = vld [vmem:[%s3952_s8 + $0x18] sm:$0xff]  ;;  %v2796_v47 = vld [vmem:[%s3951_s7] ss:$0 sm:$0xff]  ;;  %v3206_v52 = vpack.c.bf16 %v2543_v51, %v2542_v50  ;;  %v2544_v53 = vld [vmem:[%s3954_s10 + $0x10] sm:$0xff] }
 0x320   : > { %3073 = vmatpush3.msra.mxu1 %v1455_v57  ;;  %3074 = vmatprep.mubr.msk.f32.mxu1 %vm3346_vm0, %v3347_v11 }
 0x321   : > { %v1817_v59 = vmul.f32 %v3264_v30, %v1813_v54  ;;  %v1810_v60 = vsub.f32 2.0, %v1806_v58  ;;  %3082 = vmatprep.subr.mxu1 %v3347_v11  ;;  %v2546_v54 = vld [vmem:[%s3954_s10 + $0x20] sm:$0xff]  ;;  %v2547_v58 = vld [vmem:[%s3954_s10 + $0x28] sm:$0xff] }
 0x323   : > { %v1814_v61 = vmul.f32 %v3274_v55, %v1810_v60  ;;  %3070 = vmatmul.mubr.msk.f32.vlgmr.msra.gmra.mrb[20].mxu0 %vm1458_vm2, %v1817_v59  ;;  %v2545_v55 = vld [vmem:[%s3954_s10 + $0x18] sm:$0xff]  ;;  %v3212_v59 = vpack.c.bf16 %v2547_v58, %v2546_v54  ;;  %v2548_v60 = vld [vmem:[%s3954_s10 + $0x30] sm:$0xff] }
 0x324   : > { %3079 = vmatprep.mubr.msk.f32.mxu0 %vm3346_vm0, %v3347_v11  ;;  %3078 = vmatpush3.msra.mxu0 %v2111_v56  ;;  %v3209_v57 = vpack.c.bf16 %v2545_v55, %v2544_v53  ;;  %v2797_v56 = vld [vmem:[%s3953_s9] ss:$0 sm:$0xff] }
 0x325   : > { %v1818_v62 = vmul.f32 %v3266_v32, %v1814_v61  ;;  %3087 = vmatprep.subr.mxu0 %v3347_v11  ;;  %v2549_v61 = vld [vmem:[%s3954_s10 + $0x38] sm:$0xff] }
 0x327   : > { %3075 = vmatmul.mubr.msk.f32.vlgmr.msra.gmra.mrb[16].mxu1 %vm1458_vm2, %v1818_v62  ;;  %v3215_v62 = vpack.c.bf16 %v2549_v61, %v2548_v60 }
 0x328   : > { %3084 = vmatprep.mubr.msk.f32.mxu1 %vm3346_vm0, %v3347_v11  ;;  %3083 = vmatpush3.msra.mxu1 %v2112_v63 }
 0x329   : > { %3092 = vmatprep.subr.mxu1 %v3347_v11 }
 0x3ee   : > { %v1888_v1 = vpop.f32.mrb[18].mxu0 }
 0x3ef   : > { %v3061_v2 = vpop.f32.mrb[19].mxu0  ;;  %3080 = vmatmul.mubr.msk.f32.vlgmr.msra.gmra.mrb[22].mxu0 %vm1458_vm2, %v1888_v1 }
 0x3f0   : > { %3088 = vmatpush3.msra.mxu0 %v2113_v0  ;;  %3089 = vmatprep.mubr.msk.f32.mxu0 %vm3346_vm0, %v3347_v11 }
 0x3f1   : > { %3199 = vmatprep.subr.bf16.mxu0 %v3345_v3 }
 0x3f2   : > { %v1961_v5 = vpop.f32.mrb[14].mxu1 }
 0x3f3   : > { %v3066_v6 = vpop.f32.mrb[15].mxu1  ;;  %3085 = vmatmul.mubr.msk.f32.vlgmr.msra.gmra.mrb[18].mxu1 %vm1458_vm2, %v1961_v5 }
 0x3f4   : > { %3093 = vmatpush3.msra.mxu1 %v2114_v4  ;;  %3094 = vmatprep.mubr.msk.f32.mxu1 %vm3346_vm0, %v3347_v11 }
 0x3f5   : > { %3205 = vmatprep.subr.bf16.mxu1 %v3345_v3 }
 0x3f6   : > { %v2034_v7 = vpop.f32.mrb[20].mxu0 }
 0x3f7   : > { %v3071_v8 = vpop.f32.mrb[21].mxu0  ;;  %3090 = vmatmul.mubr.msk.f32.vlgmr.msra.gmra.mrb[24].mxu0 %vm1458_vm2, %v2034_v7  ;;  %v2799_v7 = vld [vmem:[%s3955_s11] ss:$0 sm:$0xff] }
 0x3f8   : > { %3105 = vmatprep.mubr.msk.f32.mxu0 %vm3346_vm0, %v3347_v11  ;;  %3201 = vmatpush3.bf16.msra.mxu0 %v3200_v38 }
 0x3f9   : > { %3202 = vmatprep.subr.bf16.mxu0 %v3345_v3 }
 0x3fa   : > { %v2107_v9 = vpop.f32.mrb[16].mxu1 }
 0x3fb   : > { %v3076_v10 = vpop.f32.mrb[17].mxu1  ;;  %3095 = vmatmul.mubr.msk.f32.vlgmr.msra.gmra.mrb[20].mxu1 %vm1458_vm2, %v2107_v9 }
 0x3fc   : > { %3124 = vmatprep.mubr.msk.f32.mxu1 %vm3346_vm0, %v3347_v11  ;;  %v2794_v11 = vld [vmem:[%s3949_s5] ss:$0 sm:$0xff]  ;;  %3207 = vmatpush3.bf16.msra.mxu1 %v3206_v52 }
 0x3fd   : > { %3208 = vmatprep.subr.bf16.mxu1 %v3345_v3 }
 0x400   : > { %3210 = vmatpush3.bf16.msra.mxu1 %v3209_v57 }
 0x401   : > { %3211 = vmatprep.subr.bf16.mxu1 %v3345_v3 }
 0x404   : > { %3213 = vmatpush3.bf16.msra.mxu1 %v3212_v59 }
 0x405   : > { %3214 = vmatprep.subr.bf16.mxu1 %v3345_v3 }
 0x408   : > { %3216 = vmatpush3.bf16.msra.mxu1 %v3215_v62 }
 0x4c2   : > { %v2184_v12 = vpop.f32.mrb[22].mxu0 }
 0x4c3   : > { %v3081_v13 = vpop.f32.mrb[23].mxu0  ;;  %v2407_v15 = vsel %vm614_vm1, %v2184_v12, 0.0 }
 0x4c6   : > { %v2257_v14 = vpop.f32.mrb[18].mxu1 }
 0x4c7   : > { %v2408_v16 = vsel %vm614_vm1, %v2257_v14, 0.0  ;;  %v3086_v17 = vpop.f32.mrb[19].mxu1 }
 0x4c8   : > { %v2409_v19 = vadd.f32 %v2408_v16, %v2407_v15 }
 0x4ca   : > { %v2330_v20 = vpop.f32.mrb[24].mxu0 }
 0x4cb   : > { %v2410_v21 = vsel %vm614_vm1, %v2330_v20, 0.0  ;;  %v3091_v22 = vpop.f32.mrb[25].mxu0 }
 0x4cc   : > { %v2411_v23 = vadd.f32 %v2410_v21, %v2409_v19 }
 0x4ce   : > { %v2403_v24 = vpop.f32.mrb[20].mxu1 }
 0x4cf   : > { %v2412_v25 = vsel %vm614_vm1, %v2403_v24, 0.0  ;;  %v3096_v26 = vpop.f32.mrb[21].mxu1  ;;  %v2801_v24 = vld [vmem:[%s3956_s12] ss:$0 sm:$0xff] }
 0x4d0   : > { %v2413_v27 = vadd.f32 %v2412_v25, %v2411_v23 }
 0x4d2   : > { %v2421_v28 = vadd.f32 %v2794_v11, %v2413_v27  ;;  %v2802_v11 = vld [vmem:[%s3957_s13] ss:$0 sm:$0xff] }
 0x4d4   : > { %v2422_v29 = vadd.f32 %v2421_v28, %v3526_v18  ;;  %v2455_v18 = vld [vmem:[%s3952_s8 + $0x10] sm:$0xff] }
 0x4d5   : > { %v3203_v40 = vpack.c.bf16 %v2456_v39, %v2455_v18 }
 0x4d6   : > { %v2425_v30 = vsel %vm614_vm1, %v2422_v29, 0.0 }
 0x4d7   : > { %2426 = vadd.xlane.f32.xlu0 %v2425_v30  ;;  %3204 = vmatpush3.bf16.msra.mxu0 %v3203_v40 }
 0x564   : > { %v2427_v31 = vpop.xlane.xlu0 %2426 }
 0x565   : > { %v2429_v32 = vmul.f32 0.03125, %v2427_v31 }
 0x567   : > { %v2430_v33 = vsub.f32 %v2422_v29, %v2429_v32 }
 0x569   : > { %v2431_v34 = vmul.f32 %v2430_v33, %v2430_v33 }
 0x56b   : > { %v2432_v35 = vsel %vm614_vm1, %v2431_v34, 0.0 }
 0x56c   : > { %2433 = vadd.xlane.f32.xlu1 %v2432_v35 }
 0x5f9   : > { %v2434_v41 = vpop.xlane.xlu1 %2433 }
 0x5fa   : > { %v2435_v42 = vmul.f32 0.03125, %v2434_v41 }
 0x5fc   : > { %v2436_v43 = vadd.f32 1e-05, %v2435_v42 }
 0x5fe   : > { %3275 = vrsqrt.f32 %v2436_v43 }
 0x608   : > { %v3276_v44 = vpop.eup %3275 }
 0x609   : > { %v2438_v46 = vmul.f32 %v3276_v44, %v2430_v33 }
 0x60b   : > { %v2445_v48 = vmul.f32 %v2795_v45, %v2438_v46 }
 0x60d   : > { %v2452_v49 = vadd.f32 %v2796_v47, %v2445_v48 }
 0x60f   : > { %3106 = vmatmul.mubr.msk.f32.vlgmr.msra.gmra.mrb[26].mxu0 %vm614_vm1, %v2452_v49 }
 0x6e2   : > { %v2533_v63 = vpop.f32.mrb[26].mxu0 }
 0x6e3   : > { %v2534_v0 = vadd.f32 %v2797_v56, %v2533_v63  ;;  %v3107_v1 = vpop.f32.mrb[27].mxu0 }
 0x6e5   : > { %v2538_v2 = vmul.f32 0.70710677, %v2534_v0  ;;  %v2537_v4 = vmul.f32 0.5, %v2534_v0 }
 0x6e7   : > { %3277 = verf.f32 %v2538_v2 }
 0x6f1   : > { %v3278_v3 = vpop.eup %3277 }
 0x6f2   : > { %v2540_v5 = vadd.f32 1.0, %v3278_v3 }
 0x6f4   : > { %v2541_v6 = vmul.f32 %v2540_v5, %v2537_v4 }
 0x6f6   : > { %3125 = vmatmul.mubr.msk.f32.vlgmr.msra.gmra.mrb[22].mxu1 %vm2557_vm3, %v2541_v6 }
 0x7c9   : > { %v2627_v8 = vpop.f32.mrb[22].mxu1 }
 0x7ca   : > { %v2628_v9 = vadd.f32 %v2799_v7, %v2627_v8  ;;  %v3126_v10 = vpop.f32.mrb[23].mxu1 }
 0x7cc   : > { %v2631_v12 = vadd.f32 %v2628_v9, %v2452_v49 }
 0x7ce   : > { %v2634_v13 = vsel %vm614_vm1, %v2631_v12, 0.0 }
 0x7cf   : > { %2635 = vadd.xlane.f32.xlu0 %v2634_v13 }
 0x85c   : > { %v2636_v14 = vpop.xlane.xlu0 %2635 }
 0x85d   : > { %v2637_v15 = vmul.f32 0.03125, %v2636_v14 }
 0x85f   : > { %v2638_v16 = vsub.f32 %v2631_v12, %v2637_v15 }
 0x861   : > { %v2639_v17 = vmul.f32 %v2638_v16, %v2638_v16 }
 0x863   : > { %v2640_v19 = vsel %vm614_vm1, %v2639_v17, 0.0 }
 0x864   : > { %2641 = vadd.xlane.f32.xlu1 %v2640_v19 }
 0x8f1   : > { %v2642_v20 = vpop.xlane.xlu1 %2641 }
 0x8f2   : > { %v2643_v21 = vmul.f32 0.03125, %v2642_v20 }
 0x8f4   : > { %v2644_v22 = vadd.f32 1e-05, %v2643_v21 }
 0x8f6   : > { %3279 = vrsqrt.f32 %v2644_v22 }
 0x900   : > { %v3280_v23 = vpop.eup %3279 }
 0x901   : > { %v2646_v25 = vmul.f32 %v3280_v23, %v2638_v16 }
 0x903   : > { %v2653_v26 = vmul.f32 %v2801_v24, %v2646_v25 }
 0x905   : > { %v2660_v27 = vadd.f32 %v2802_v11, %v2653_v26 }
 0x907   : > { %2661 = vst.msk [vmem:[%s471_s20] sm:$0xff] %vm614_vm1, %v2660_v27 }
 0x908   : > { %3294 = shalt.err (!%p3291_p3)
}
 0x909   : > { %s3295_s27 = scalar_lea.hbm %s3901_s25, 128  ;;  %s3299_s20 = scalar_lea.hbm %s3958_s14, 256 }
 0x90a   : > { %p3296_p4 = scmp.ne.s32.totalorder %s3901_s25, %s3295_s27  ;;  %p3300_p9 = scmp.lt.u32.totalorder %s3901_s25, %s3958_s14 }
 0x90b   : > { %p3301_p10 = scmp.lt.u32.totalorder %s3299_s20, %s3295_s27  ;;  %p3303_p12 = scmp.lt.u32.totalorder %s3295_s27, %s3901_s25 }
 0x90c   : > { %p3297_p7 = pnand %p3296_p4, %p3462_p5 }
 0x90d   : > { %p3302_p11 = por %p3301_p10, %p3300_p9 }
 0x90e   : > { %p3298_p8 = pneg %p3297_p7 }
 0x90f   : > { %p3304_p13 = por %p3303_p12, %p3302_p11 }
 0x911   : > { %p3305_p0 = pnand %p3304_p13, %p3298_p8 }
 0x913   : > { %3308 = shalt.err (!%p3305_p0)
}
 0x914   : > { %3217 = dma.vmem_to_hbm [thread:$0]  (%p3462_p5), %s3903_s15, 128, %s3901_s25, %s2663_s22  }
 0x915 PF: > { %s3971_s26 = sld [smem:[#allocation5_spill]]  ;;  %p3223_p1 = scmp.ge.s32.totalorder %s3343_s16, 2 }
 0x917   : > { %p3220_p2 = pnand %p3223_p1, %p3466_p6 }
 0x91b   : > { %s2688_s29 = sand.u32 1, %s3971_s26  }
 0x91c   : > { %s2689_s24 = scalar_lea.sflag [#allocation3], %s2688_s29 }
 0x91d   : > { %3326 = dma.done.wait (!%p3220_p2), %s2689_s24, 128  }
 0x91e   : > { %3328 = vsyncadd (!%p3220_p2), %s2689_s24, 4294967168  ;;  %s3973_s16 = sld [smem:[#allocation7_spill]]  ;;  %s3974_s27 = sld [smem:[#allocation6_spill]] }
 0x91f   : > { %s3975_s15 = sld [smem:[#allocation8_spill]]  ;;  %s3976_s29 = smov %s3335_s30 }
 0x924   : > { %p24_p3 = scmp.ge.s32.totalorder %s3973_s16, 4   ;;  %s3977_s30 = smov %s3974_s27 }
 0x926   :  { %26 = sbr.rel (!%p24_p3) target bundleno = 3 (0x3), region = 114 }
 0x92d   :  { %2694 = vsyncpa [#allocation3], 1 }
 0x92e   :  { %2696 = vsyncpa [#allocation3 + $0x1], 1 }

</bundles_post_ra>
